<compile_context>
chip_gen: v6e
topology: v6e:2x2x1
jax: 0.10.0
libtpu: 0.0.40
codegen_flags: <defaults>
</compile_context>

<pallas_src>
import jax
import jax.numpy as jnp
import numpy as np
from jax.experimental import pallas as pl
from jax.experimental.pallas import tpu as pltpu

LANE = 128
SUB = 8


def _round_up(v, m):
    return (v + m - 1) // m * m


def fold_bn(gamma, beta, mean, var, eps=1e-5):
    scale = gamma / jnp.sqrt(var + eps)
    return scale, beta - mean * scale


def _vmem_capacity_bytes():
    try:
        return int(pltpu.get_tpu_info().vmem_capacity_bytes)
    except Exception:
        return 64 * 1024 * 1024  # conservative default (v7x per-core VMEM)


def _footprint_bytes(TH, Wx, Cp, Chid, Coutp):
    """Rough per-step VMEM footprint (scratch + double-buffered operands)."""
    M0 = (TH + 4) * Wx
    M1 = (TH + 2) * Wx
    M2 = TH * Wx
    xbuf = 2 * M0 * Cp * 2                                   # bf16 DMA dbl buffer
    hbuf = M1 * Chid * 2                                     # bf16 cv1 activations
    wts = 2 * 3 * (Cp * 3 * Chid + Chid * 3 * Coutp) * 2     # dbl-buffered bf16 weights
    outb = 2 * M2 * Coutp * 4                                # dbl-buffered output block
    maskb = 2 * M1 * LANE * 4                                # lane-padded mask block
    interm = (M1 * 3 * Chid + 2 * M1 * Chid +                # wide dot results, h, parts
              M2 * 3 * Coutp + 3 * M2 * Coutp) * 4
    return int(1.2 * (xbuf + hbuf + wts + outb + maskb + interm))


def _pick_tile_h(H, Wx, Cp, Chid, Coutp, budget, max_rows=256):
    best = 1
    for th in range(1, min(H, max_rows) + 1):
        if _footprint_bytes(th, Wx, Cp, Chid, Coutp) <= budget:
            best = th
        else:
            break
    return best


_ROLL_LIKE_JNP = None


def _roll_matches_jnp():
    """One-time tiny probe of pltpu.roll's shift convention (direction-proof)."""
    global _ROLL_LIKE_JNP
    if _ROLL_LIKE_JNP is None:
        x = jnp.arange(8, dtype=jnp.float32)[:, None] * jnp.ones((1, LANE), jnp.float32)

        def probe(x_ref, o_ref):
            o_ref[...] = pltpu.roll(x_ref[...], shift=1, axis=0)

        y = pl.pallas_call(probe, out_shape=jax.ShapeDtypeStruct((8, LANE), jnp.float32))(x)
        _ROLL_LIKE_JNP = bool(float(y[0, 0]) > 3.5)  # 7.0 => jnp.roll convention
    return _ROLL_LIKE_JNP


def _make_kernel(TH, Wx, Chid, Coutp, has_residual, roll_like_jnp):
    M0 = (TH + 4) * Wx   # input rows per tile (2-row/2-col halo, flattened)
    M1 = (TH + 2) * Wx   # cv1 output rows (1-row/1-col halo for cv2)
    M2 = TH * Wx         # cv2 output rows

    def shift_up(v, k, m):
        # u[i] = v[i + k] (circular; wrapped rows only land on padding columns
        # that are never consumed / are sliced away on the host).
        if k == 0:
            return v
        return pltpu.roll(v, shift=(m - k) if roll_like_jnp else k, axis=0)

    def conv3x3(src, w_ref, m_out, cout):
        """3x3 'same' conv on the flattened tile: 3 wide MXU matmuls (kw folded
        into N = 3*cout) + XLU shifts of the lane-aligned result chunks."""
        acc = None
        for kh in range(3):
            xk = src[pl.ds(kh * Wx, m_out), :]                           # (m_out, Cin)
            y = jnp.dot(xk, w_ref[kh], preferred_element_type=jnp.float32)
            part = (y[:, :cout]
                    + shift_up(y[:, cout:2 * cout], 1, m_out)
                    + shift_up(y[:, 2 * cout:3 * cout], 2, m_out))
            acc = part if acc is None else acc + part
        return acc

    def silu(v):
        return v * (1.0 / (1.0 + jnp.exp(-v)))

    def kernel(x_hbm, mask_ref, w1_ref, b1_ref, w2_ref, b2_ref,
               o_ref, xbuf, hbuf, sem):
        n = pl.program_id(0)
        t = pl.program_id(1)
        nb = pl.num_programs(0)
        nt = pl.num_programs(1)
        step = n * nt + t
        slot = step % 2

        def fetch(nn, tt, sl):
            pltpu.make_async_copy(
                x_hbm.at[nn, pl.ds(tt * (TH * Wx), M0)],
                xbuf.at[sl], sem.at[sl]).start()

        # Prime slot 0 at the very first grid step.
        @pl.when(step == 0)
        def _():
            fetch(0, 0, 0)

        # Prefetch the NEXT (n, t) tile while this one is being computed.
        @pl.when(step + 1 < nb * nt)
        def _():
            wrap = t == nt - 1
            fetch(jnp.where(wrap, n + 1, n), jnp.where(wrap, 0, t + 1), 1 - slot)

        # Wait for the current tile's halo window.
        pltpu.make_async_copy(
            x_hbm.at[n, pl.ds(t * (TH * Wx), M0)],
            xbuf.at[slot], sem.at[slot]).wait()
        cur = xbuf.at[slot]

        # ---- cv1: conv3x3 (BN folded into w1) + bias + SiLU; halo ring that
        #      corresponds to cv2's zero padding is zeroed by the mask. -------
        h = conv3x3(cur, w1_ref, M1, Chid) + b1_ref[...]
        h = silu(h) * mask_ref[0]
        hbuf[...] = h.astype(jnp.bfloat16)

        # ---- cv2: conv3x3 (BN folded into w2) + bias + SiLU (+ residual) ----
        y = conv3x3(hbuf, w2_ref, M2, Coutp) + b2_ref[...]
        y = silu(y)
        if has_residual:
            # Residual = interior of the input tile (same flattened frame,
            # offset by the 2-px halo).
            y = y + cur[pl.ds(2 * Wx + 2, M2), :].astype(jnp.float32)
        o_ref[0] = y.astype(o_ref.dtype)

    return kernel


def bottleneck_forward_nhwc(x, params, shortcut=True):
    """Fused Bottleneck forward, NHWC in / NHWC out.  x: (N, H, W, c1) f32."""
    N, H, W, c1 = x.shape
    w1, w2 = params["w1"], params["w2"]
    assert w1.shape[:2] == (3, 3) and w2.shape[:2] == (3, 3), "only k=(3,3)"
    c_ = w1.shape[-1]
    c2 = w2.shape[-1]
    assert w1.shape[2] == c1 and w2.shape[2] == c_

    s1, b1 = fold_bn(params["bn1_gamma"], params["bn1_beta"],
                     params["bn1_mean"], params["bn1_var"])
    s2, b2 = fold_bn(params["bn2_gamma"], params["bn2_beta"],
                     params["bn2_mean"], params["bn2_var"])

    Cp = _round_up(c1, LANE)
    Chid = _round_up(c_, LANE)
    Coutp = _round_up(c2, LANE)
    add = shortcut and (c1 == c2)

    # BN folded into the conv weights; the 3 kw taps are concatenated along the
    # output dim so each conv is 3 wide (K x 3*Cout) MXU matmuls, not 9 narrow.
    w1p = jnp.zeros((3, 3, Cp, Chid), jnp.float32).at[:, :, :c1, :c_].set(
        w1 * s1[None, None, None, :])
    w1wide = jnp.transpose(w1p, (0, 2, 1, 3)).reshape(3, Cp, 3 * Chid).astype(jnp.bfloat16)
    b1p = jnp.zeros((1, Chid), jnp.float32).at[0, :c_].set(b1)

    w2p = jnp.zeros((3, 3, Chid, Coutp), jnp.float32).at[:, :, :c_, :c2].set(
        w2 * s2[None, None, None, :])
    w2wide = jnp.transpose(w2p, (0, 2, 1, 3)).reshape(3, Chid, 3 * Coutp).astype(jnp.bfloat16)
    b2p = jnp.zeros((1, Coutp), jnp.float32).at[0, :c2].set(b2)

    # Sublane-friendly row pitch; tile height from the VMEM budget of the chip.
    Wx = _round_up(W + 4, SUB)
    vmem_cap = _vmem_capacity_bytes()
    TH = _pick_tile_h(H, Wx, Cp, Chid, Coutp, budget=int(0.45 * vmem_cap))
    nt = -(-H // TH)          # cdiv; no exact-divisor requirement on H
    Hp = nt * TH

    M0 = (TH + 4) * Wx
    M1 = (TH + 2) * Wx
    M2 = TH * Wx

    # ONE host pass: 2-px spatial halo (covers SAME padding of both fused
    # convs), channel pad to the lane grid, bf16 cast, rows flattened so each
    # tile's halo window is a single contiguous DMA.
    xp = jnp.zeros((N, Hp + 4, Wx, Cp), jnp.bfloat16)
    xp = xp.at[:, 2:H + 2, 2:W + 2, :c1].set(x.astype(jnp.bfloat16))
    x_flat = xp.reshape(N, (Hp + 4) * Wx, Cp)

    # cv1-output validity mask per row tile (zero = outside-the-image halo,
    # i.e. cv2's zero padding), precomputed on the host.
    r1 = np.arange(TH + 2)
    cidx = np.arange(Wx)
    col_ok = (cidx >= 1) & (cidx <= W)
    mask_np = np.empty((nt, M1, 1), np.float32)
    for t in range(nt):
        img_row = t * TH + r1 - 1
        row_ok = (img_row >= 0) & (img_row < H)
        mask_np[t, :, 0] = (row_ok[:, None] & col_ok[None, :]).astype(np.float32).reshape(-1)
    mask = jnp.asarray(mask_np)

    kernel = _make_kernel(TH, Wx, Chid, Coutp, add, _roll_matches_jnp())

    fp = _footprint_bytes(TH, Wx, Cp, Chid, Coutp)
    vmem_limit = int(min(0.92 * vmem_cap, max(2 * fp, 32 * 1024 * 1024)))

    out_flat = pl.pallas_call(
        kernel,
        out_shape=jax.ShapeDtypeStruct((N, Hp * Wx, Coutp), x.dtype),
        grid=(N, nt),
        in_specs=[
            pl.BlockSpec(memory_space=pl.ANY),                            # x (HBM, manual DMA)
            pl.BlockSpec((1, M1, 1), lambda n, t: (t, 0, 0)),             # cv1 halo mask
            pl.BlockSpec((3, Cp, 3 * Chid), lambda n, t: (0, 0, 0)),      # w1 (folded, wide)
            pl.BlockSpec((1, Chid), lambda n, t: (0, 0)),                 # b1
            pl.BlockSpec((3, Chid, 3 * Coutp), lambda n, t: (0, 0, 0)),   # w2 (folded, wide)
            pl.BlockSpec((1, Coutp), lambda n, t: (0, 0)),                # b2
        ],
        out_specs=pl.BlockSpec((1, M2, Coutp), lambda n, t: (n, t, 0)),
        scratch_shapes=[
            pltpu.VMEM((2, M0, Cp), jnp.bfloat16),    # input halo DMA double buffer
            pltpu.VMEM((M1, Chid), jnp.bfloat16),     # cv1 activations
            pltpu.SemaphoreType.DMA((2,)),
        ],
        compiler_params=pltpu.CompilerParams(
            dimension_semantics=("arbitrary", "arbitrary"),
            vmem_limit_bytes=vmem_limit,
        ),
    )(x_flat, mask, w1wide, b1p, w2wide, b2p)

    out = out_flat.reshape(N, Hp, Wx, Coutp)[:, :H, :W, :c2]
    return out


def bottleneck_forward(x_nchw, params, shortcut=True):
    """Bottleneck forward with the PyTorch NCHW interface."""
    # TODO(synk): keep the surrounding model NHWC to drop these relayout passes.
    assert x_nchw.ndim == 4
    x = jnp.transpose(x_nchw, (0, 2, 3, 1))
    y = bottleneck_forward_nhwc(x, params, shortcut=shortcut)
    return jnp.transpose(y, (0, 3, 1, 2))


def init_params(key, c1, c2, e=0.5, k=(3, 3)):
    c_ = int(c2 * e)
    keys = jax.random.split(key, 10)
    return {
        # conv weights stored as (KH, KW, Cin, Cout)
        "w1": jax.random.normal(keys[0], (k[0], k[0], c1, c_), jnp.float32) * 0.1,
        "w2": jax.random.normal(keys[1], (k[1], k[1], c_, c2), jnp.float32) * 0.1,
        "bn1_gamma": 1.0 + 0.1 * jax.random.normal(keys[2], (c_,), jnp.float32),
        "bn1_beta": 0.1 * jax.random.normal(keys[3], (c_,), jnp.float32),
        "bn1_mean": 0.1 * jax.random.normal(keys[4], (c_,), jnp.float32),
        "bn1_var": 0.5 + jnp.abs(jax.random.normal(keys[5], (c_,), jnp.float32)),
        "bn2_gamma": 1.0 + 0.1 * jax.random.normal(keys[6], (c2,), jnp.float32),
        "bn2_beta": 0.1 * jax.random.normal(keys[7], (c2,), jnp.float32),
        "bn2_mean": 0.1 * jax.random.normal(keys[8], (c2,), jnp.float32),
        "bn2_var": 0.5 + jnp.abs(jax.random.normal(keys[9], (c2,), jnp.float32)),
    }


def _reference_bottleneck(x_nchw, params, shortcut=True):
    """Pure-JAX f32 reference of the PyTorch Bottleneck forward (eval-mode BN)."""
    x = jnp.transpose(x_nchw, (0, 2, 3, 1))

    def conv_bn_silu(inp, w, gamma, beta, mean, var):
        y = jax.lax.conv_general_dilated(
            inp, w, window_strides=(1, 1), padding="SAME",
            dimension_numbers=("NHWC", "HWIO", "NHWC"),
            precision=jax.lax.Precision.HIGHEST)
        s = gamma / jnp.sqrt(var + 1e-5)
        y = y * s + (beta - mean * s)
        return y * jax.nn.sigmoid(y)

    h = conv_bn_silu(x, params["w1"], params["bn1_gamma"], params["bn1_beta"],
                     params["bn1_mean"], params["bn1_var"])
    y = conv_bn_silu(h, params["w2"], params["bn2_gamma"], params["bn2_beta"],
                     params["bn2_mean"], params["bn2_var"])
    if shortcut and x.shape[-1] == y.shape[-1]:
        y = y + x
    return jnp.transpose(y, (0, 3, 1, 2))


if __name__ == "__main__":
    key = jax.random.PRNGKey(0)
    kx, kp = jax.random.split(key)

    # Small shapes: batch=2, c1=c2=4 (shortcut add active), 16x16 spatial.
    N, C, H, W = 2, 4, 16, 16
    x = jax.random.normal(kx, (N, C, H, W), jnp.float32)
    params = init_params(kp, c1=C, c2=C, e=0.5, k=(3, 3))

    y = bottleneck_forward(x, params, shortcut=True)
    jax.block_until_ready(y)
    assert y.shape == (N, C, H, W), y.shape

    # Sanity check against the pure-JAX reference (bf16 MXU => loose tolerance).
    y_ref = _reference_bottleneck(x, params, shortcut=True)
    np.testing.assert_allclose(np.asarray(y), np.asarray(y_ref),
                               rtol=5e-2, atol=5e-2)

    print("KERNEL_OK")
</pallas_src>

<mosaic_0001>
module attributes {stable_mosaic.version = 11 : i64} {
  func.func @probe(%arg0: memref<8x128xf32, #tpu.memory_space<vmem>>, %arg1: memref<8x128xf32, #tpu.memory_space<vmem>>) attributes {dimension_semantics = [], scalar_prefetch = 0 : i64, scratch_operands = 0 : i64, tpu.core_type = #tpu.core_type<tc>} {
    %c0 = arith.constant 0 : index
    %c0_0 = arith.constant 0 : index
    %0 = vector.load %arg0[%c0, %c0_0] : memref<8x128xf32, #tpu.memory_space<vmem>>, vector<8x128xf32>
    %c1_i32 = arith.constant 1 : i32
    %1 = tpu.dynamic_rotate %0 by %c1_i32 dim 0 : vector<8x128xf32>, i32 -> vector<8x128xf32>
    %c0_1 = arith.constant 0 : index
    %c0_2 = arith.constant 0 : index
    %2 = vector.load %arg1[%c0_1, %c0_2] : memref<8x128xf32, #tpu.memory_space<vmem>>, vector<8x128xf32>
    tpu.vector_store %arg1[%c0_1, %c0_2], %1 {strides = array<i32>} : memref<8x128xf32, #tpu.memory_space<vmem>>, vector<8x128xf32>,
    return
  }
}

</mosaic_0001>

<bundles_post_ra>
// kernel: tpu_custom_call.1
= control target key start
LH: loop header
LB: loop body
LE: loop exit
PB: predicated region body
PF: predicated region fallthrough
CT: control target
= control target key end

     0   :  { %6 = vsyncpa [#allocation3], 0  ;;  %s103_s0 = inlined_call_operand.hbm [shape: f32[8,128], index: 0, kind: input, shape index: {}]   ;;  %s104_s1 = inlined_call_operand.hbm [shape: f32[8,128], index: 1, kind: output, shape index: {}]  }
   0x1   :  { %7 = vsyncpa [#allocation4], 0  ;;  %s85_s6 = smov [#allocation2]  }
   0x2   :  { %s14_s7 = sshll.u32 %s85_s6, 4  ;;  %s15_s7 = int_to_ptr.vmem [resolvable:$true] %s14_s7 }
   0x3   :  { %s49_s8 = scalar_lea.vmem %s15_s7, 128  ;;  %p54_p1 = scmp.lt.s32.totalorder %s15_s7, %s15_s7 }
   0x4   :  { %p50_p0 = scmp.ne.s32.totalorder %s15_s7, %s49_s8  ;;  %p55_p2 = scmp.lt.s32.totalorder %s49_s8, %s49_s8 }
   0x6   :  { %p56_p3 = por %p55_p2, %p54_p1 }
   0x8   :  { %p57_p4 = pnand %p56_p3, %p50_p0 }
   0xa   :  { %60 = shalt.err (!%p57_p4)
}
   0xb   :  { %17 = dma.hbm_to_vmem [thread:$0]  %s103_s0, 128, %s15_s7, [#allocation3]  }
   0xc   :  { %81 = dma.done.wait [#allocation3], 128  }
   0xd   :  { %82 = vsyncadd [#allocation3], 4294967168  ;;  %s86_s11 = smov [#allocation5]   ;;  %v21_v0 = vld [vmem:[#allocation2] sm:$0xff] }
   0xe   :  { %s30_s12 = sshll.u32 %s86_s11, 4  ;;  %v22_v1 = vrot.slane %v21_v0, 7  ;;  %s31_s12 = int_to_ptr.vmem [resolvable:$true] %s30_s12 }
   0xf   :  { %s61_s13 = scalar_lea.vmem %s31_s12, 128  ;;  %p66_p6 = scmp.lt.s32.totalorder %s31_s12, %s31_s12 }
  0x10   :  { %23 = vst [vmem:[#allocation5] sm:$0xff] %v22_v1  ;;  %p62_p5 = scmp.ne.s32.totalorder %s31_s12, %s61_s13  ;;  %p67_p7 = scmp.lt.s32.totalorder %s61_s13, %s61_s13 }
  0x12   :  { %p68_p8 = por %p67_p7, %p66_p6 }
  0x14   :  { %p69_p9 = pnand %p68_p8, %p62_p5 }
  0x16   :  { %72 = shalt.err (!%p69_p9)
}
  0x17   :  { %33 = dma.vmem_to_hbm [thread:$0]  %s31_s12, 128, %s104_s1, [#allocation4]  }
  0x18   :  { %83 = dma.done.wait [#allocation4], 128  }
  0x19   :  { %84 = vsyncadd [#allocation4], 4294967168 }
  0x1a   :  { %37 = vsyncpa [#allocation3], 1 }
  0x1b   :  { %38 = vsyncpa [#allocation4], 1 }

</bundles_post_ra>
